<compile_context>
chip_gen: v7x
topology: tpu7x:2x2x1
jax: 0.10.0
libtpu: 0.0.40
codegen_flags: <defaults>
</compile_context>

<pallas_src>
import functools

import numpy as np
import jax
import jax.numpy as jnp
from jax.experimental import pallas as pl
from jax.experimental.pallas import tpu as pltpu


def _round_up(v, m):
    return (v + m - 1) // m * m


def _make_cutouts_kernel(ly_ref, x_ref, lxT_ref, o_ref, s_scr, s2_scr, *,
                         K, H_pad, Q_pad, G):
    """One grid step processes a group of G cutouts.

    ly_ref : (G, P_pad, H_pad)     averaging matrices along H (per cutout)
    x_ref  : (K*H_pad, W)          whole image stack, VMEM resident
    lxT_ref: (1, W, G*Q_pad)       averaging matrices along W, batched on N
    o_ref  : (G, P_pad, K*Q_pad)   lane-dense output slabs
    s_scr  : (K*H_pad, G*Q_pad)    stage-1 result (compute dtype)
    s2_scr : (H_pad, K*Q_pad)      relayout scratch for stage 2
    """
    # Stage 1: pool along W for the whole group at once -- one canonical A@B
    # with N = G*Q_pad (fills the MXU N dim, X pushed through the MXU once).
    s_scr[...] = jnp.dot(x_ref[...], lxT_ref[0],
                         preferred_element_type=jnp.float32).astype(s_scr.dtype)

    for j in range(G):                      # static unroll over cutouts in group
        # Stage 2a: relayout (K*H_pad, Q_pad) column block -> (H_pad, K*Q_pad).
        # All offsets are static multiples of the (sublane, 128) tile, so these
        # are plain unmasked vld/vst copies; each store ends its slice's live
        # range (no K-wide concat keeping everything live).
        for k in range(K):
            s2_scr[:, k * Q_pad:(k + 1) * Q_pad] = (
                s_scr[k * H_pad:(k + 1) * H_pad, j * Q_pad:(j + 1) * Q_pad])
        # Stage 2b: pool along H; second canonical A@B gives the lane-dense
        # (P_pad, K*Q_pad) slab, stored unmasked at a static major index.
        o = jnp.dot(ly_ref[j], s2_scr[...], preferred_element_type=jnp.float32)
        o_ref[j] = o.astype(o_ref.dtype)


def _pool_matrices(cut_size, cutn, cut_pow, sideY, sideX, P_pad, Q_pad, H_pad,
                   seed=0):
    """Host-side glue: random cutout params + zero-padded averaging matrices.

    Returns float32 numpy arrays:
      Ly : (cutn, P_pad, H_pad)  rows >= cut_size / cols >= sideY are zero
      LxT: (cutn, sideX, Q_pad)  pre-transposed; cols >= cut_size are zero
    """
    # TODO(synk): RNG source differs from torch.rand/torch.randint (numpy vs
    # torch generators), so cutout placements are not bit-identical; the size
    # law, offset range and adaptive_avg_pool2d bin boundaries are exact.
    rng = np.random.RandomState(seed)
    max_size = min(sideX, sideY)
    min_size = min(sideX, sideY, cut_size)
    Ly = np.zeros((cutn, P_pad, H_pad), dtype=np.float32)
    LxT = np.zeros((cutn, sideX, Q_pad), dtype=np.float32)
    for n in range(cutn):
        size = int(rng.rand() ** cut_pow * (max_size - min_size) + min_size)
        offsetx = int(rng.randint(0, sideX - size + 1))
        offsety = int(rng.randint(0, sideY - size + 1))
        for i in range(cut_size):
            # adaptive_avg_pool2d bins: [floor(i*S/O), ceil((i+1)*S/O))
            s = (i * size) // cut_size
            e = -((-(i + 1) * size) // cut_size)
            inv = 1.0 / (e - s)
            Ly[n, i, offsety + s: offsety + e] = inv
            LxT[n, offsetx + s: offsetx + e, i] = inv
    return Ly, LxT


def make_cutouts(x, cut_size, cutn, cut_pow=1.0, seed=0,
                 compute_dtype=jnp.bfloat16):
    """x: NCHW (B, C, H, W) -> (cutn*B, C, cut_size, cut_size)."""
    B, C, H, W = x.shape
    K = B * C
    P = Q = cut_size
    cdt = jnp.dtype(compute_dtype)
    odt = jnp.dtype(x.dtype)

    sub = 8 * max(1, 4 // cdt.itemsize)    # packed-sublane multiple (bf16 -> 16)
    P_pad = _round_up(P, 8)                # sublane-aligned output rows
    Q_pad = _round_up(Q, 128)              # lane-aligned per-cutout column block
    H_pad = _round_up(H, sub)              # aligned per-image row block

    Ly_np, LxT_np = _pool_matrices(cut_size, cutn, cut_pow, H, W,
                                   P_pad, Q_pad, H_pad, seed)

    # ---------- generation-aware VMEM budgeting & cutout-group size ----------
    try:
        vmem_cap = int(getattr(pltpu.get_tpu_info(), "vmem_capacity_bytes", 0))
    except Exception:
        vmem_cap = 0
    if vmem_cap <= 0:
        vmem_cap = 64 * 1024 * 1024        # conservative default: v7x per-core

    def vmem_working_set(g):
        x_res = K * H_pad * W * cdt.itemsize                # single buffer
        ly_blk = g * P_pad * H_pad * cdt.itemsize           # double buffered
        lx_blk = W * g * Q_pad * cdt.itemsize               # double buffered
        out_blk = g * P_pad * K * Q_pad * odt.itemsize      # double buffered
        s1 = K * H_pad * g * Q_pad * cdt.itemsize           # stage-1 scratch
        s2 = H_pad * K * Q_pad * cdt.itemsize               # relayout scratch
        return x_res + 2 * (ly_blk + lx_blk + out_blk) + s1 + s2

    # Group G cutouts per grid step: fills MXU N (target G*Q_pad >= 512),
    # amortizes X through the MXU, and for small problems (G == cutn) collapses
    # the grid to a single step (no per-step pipeline overhead).
    budget = int(0.6 * vmem_cap)
    G = 1
    for cand in range(min(cutn, max(1, 512 // Q_pad)), 0, -1):
        if cutn % cand == 0 and vmem_working_set(cand) <= budget:
            G = cand
            break
    num_groups = cutn // G
    # TODO(synk): if even G == 1 exceeds the budget (huge B*C*H*W), tile X over
    # K*H row blocks with an extra grid axis instead of keeping it whole in VMEM.

    work = vmem_working_set(G)
    vmem_limit = int(min(int(0.8 * vmem_cap),
                         max(32 * 1024 * 1024, int(1.3 * work))))
    vmem_limit = max(vmem_limit, int(1.2 * work))

    # ---------- host-side operand preparation (compute dtype) ----------------
    if H_pad != H:
        x = jnp.pad(x, ((0, 0), (0, 0), (0, H_pad - H), (0, 0)))
    xf = x.reshape(K * H_pad, W).astype(cdt)       # pure reshape, no transpose

    Ly = jnp.asarray(Ly_np, cdt)                   # (cutn, P_pad, H_pad)
    # Batch each group's LxT along N: (num_groups, W, G*Q_pad), cols ordered (j, q).
    LxT_g = jnp.asarray(
        LxT_np.reshape(num_groups, G, W, Q_pad)
              .transpose(0, 2, 1, 3)
              .reshape(num_groups, W, G * Q_pad), cdt)

    # Advisory cost estimate so XLA can overlap this call with surrounding ops.
    flops = 2 * (K * H_pad * W * cutn * Q_pad          # stage 1 (all groups)
                 + cutn * P_pad * H_pad * K * Q_pad)   # stage 2
    bytes_accessed = int(xf.size * cdt.itemsize
                         + Ly.size * cdt.itemsize
                         + LxT_g.size * cdt.itemsize
                         + cutn * P_pad * K * Q_pad * odt.itemsize)
    cost = pl.CostEstimate(flops=flops, transcendentals=0,
                           bytes_accessed=bytes_accessed)

    kernel = functools.partial(_make_cutouts_kernel,
                               K=K, H_pad=H_pad, Q_pad=Q_pad, G=G)

    out = pl.pallas_call(
        kernel,
        out_shape=jax.ShapeDtypeStruct((cutn, P_pad, K * Q_pad), odt),
        grid_spec=pltpu.PrefetchScalarGridSpec(
            num_scalar_prefetch=0,
            grid=(num_groups,),
            in_specs=[
                pl.BlockSpec((G, P_pad, H_pad), lambda g: (g, 0, 0)),      # Ly
                # X is grid-invariant: single un-pipelined VMEM-resident buffer.
                pl.BlockSpec(memory_space=pltpu.MemorySpace.VMEM),         # X
                pl.BlockSpec((1, W, G * Q_pad), lambda g: (g, 0, 0)),      # LxT
            ],
            out_specs=pl.BlockSpec((G, P_pad, K * Q_pad), lambda g: (g, 0, 0)),
            scratch_shapes=[
                pltpu.VMEM((K * H_pad, G * Q_pad), cdt),    # stage-1 result
                pltpu.VMEM((H_pad, K * Q_pad), cdt),        # relayout scratch
            ],
        ),
        compiler_params=pltpu.CompilerParams(
            # TODO(synk): on v7x dual-TC, "parallel" keeps a full X copy per
            # core; a K*H row split of X would halve per-core residency for
            # very large images.
            dimension_semantics=("parallel",),
            vmem_limit_bytes=vmem_limit),
        cost_estimate=cost,
    )(Ly, xf, LxT_g)

    # TODO(synk): crop-window sparsity (scalar-prefetched, 8/128-aligned
    # offsets so only the in-crop W/H slices are contracted) is left on the
    # table; it needs a static per-trace window size (sizes vary per cutout).

    # Lane-dense kernel output (cutn, P_pad, K*Q_pad) -> torch.cat(cutouts, 0)
    # layout (cutn*B, C, P, Q).  Pure wrapper-side layout plumbing; padding
    # stripped here.
    out = out.reshape(cutn, P_pad, K, Q_pad)[:, :P, :, :Q]
    out = out.transpose(0, 2, 1, 3)                  # (cutn, K, P, Q)
    return out.reshape(cutn * B, C, P, Q)


if __name__ == "__main__":
    key = jax.random.PRNGKey(0)
    B, C, H, W = 2, 4, 16, 16
    cut_size, cutn, cut_pow = 8, 4, 1.0

    x = jax.random.normal(key, (B, C, H, W), dtype=jnp.float32)

    out = make_cutouts(x, cut_size, cutn, cut_pow, seed=0)
    out = jax.block_until_ready(out)
    assert out.shape == (cutn * B, C, cut_size, cut_size), out.shape

    # ---- checks -------------------------------------------------------------
    K = B * C
    cdt = jnp.bfloat16
    sub = 8 * max(1, 4 // jnp.dtype(cdt).itemsize)
    P_pad = _round_up(cut_size, 8)
    Q_pad = _round_up(cut_size, 128)
    H_pad = _round_up(H, sub)
    Ly_np, LxT_np = _pool_matrices(cut_size, cutn, cut_pow, H, W,
                                   P_pad, Q_pad, H_pad, seed=0)

    # (1) Mirror of the kernel math in plain JAX (same bf16 operands, f32
    #     accumulation) -- tight tolerance.
    xf_c = jnp.pad(x, ((0, 0), (0, 0), (0, H_pad - H), (0, 0)))
    xf_c = xf_c.reshape(K * H_pad, W).astype(cdt)
    Ly_c = jnp.asarray(Ly_np, cdt)
    LxT_c = jnp.asarray(LxT_np, cdt)
    slabs = []
    for n in range(cutn):
        s = jnp.dot(xf_c, LxT_c[n], preferred_element_type=jnp.float32).astype(cdt)
        s2 = jnp.concatenate([s[k * H_pad:(k + 1) * H_pad] for k in range(K)],
                             axis=1)
        slabs.append(jnp.dot(Ly_c[n], s2, preferred_element_type=jnp.float32))
    mir = jnp.stack(slabs).reshape(cutn, P_pad, K, Q_pad)
    mir = mir[:, :cut_size, :, :cut_size].transpose(0, 2, 1, 3)
    mir = mir.reshape(cutn * B, C, cut_size, cut_size)
    np.testing.assert_allclose(np.asarray(out, np.float32), np.asarray(mir),
                               rtol=5e-3, atol=5e-3)

    # (2) Float32 ground truth (exact crop + adaptive_avg_pool2d as an einsum)
    #     -- loose tolerance covering the bf16 operand cast.
    Ly32 = jnp.asarray(Ly_np)[:, :cut_size, :H]        # (cutn, P, H)
    Lx32 = jnp.asarray(LxT_np)[:, :, :cut_size]        # (cutn, W, Q)
    ref = jnp.einsum('nph,bchw,nwq->nbcpq', Ly32, x, Lx32,
                     preferred_element_type=jnp.float32)
    ref = ref.reshape(cutn * B, C, cut_size, cut_size)
    np.testing.assert_allclose(np.asarray(out, np.float32), np.asarray(ref),
                               rtol=5e-2, atol=5e-2)

    print("KERNEL_OK")
</pallas_src>

<mosaic_0001>
module attributes {stable_mosaic.version = 11 : i64} {
  func.func @_make_cutouts_kernel(%arg0: i32, %arg1: memref<4x8x16xbf16, #tpu.memory_space<vmem>>, %arg2: memref<128x16xbf16, #tpu.memory_space<vmem>>, %arg3: memref<1x16x512xbf16, #tpu.memory_space<vmem>>, %arg4: memref<4x8x1024xf32, #tpu.memory_space<vmem>>, %arg5: memref<128x512xbf16, #tpu.memory_space<vmem>>, %arg6: memref<16x1024xbf16, #tpu.memory_space<vmem>>) attributes {dimension_semantics = [#tpu.dimension_semantics<parallel>], iteration_bounds = array<i64: 1>, scalar_prefetch = 0 : i64, scratch_operands = 2 : i64, tpu.core_type = #tpu.core_type<tc>, window_params = [{transform_indices = @transform_0, window_bounds = array<i64: 4, 8, 16>}, {pipeline_mode = #tpu.pipeline_mode<synchronous>, transform_indices = @transform_1, window_bounds = array<i64: 128, 16>}, {transform_indices = @transform_2, window_bounds = array<i64: 1, 16, 512>}, {transform_indices = @transform_3, window_bounds = array<i64: 4, 8, 1024>}]} {
    %c0 = arith.constant 0 : index
    %c0_0 = arith.constant 0 : index
    %0 = vector.load %arg2[%c0, %c0_0] : memref<128x16xbf16, #tpu.memory_space<vmem>>, vector<128x16xbf16>
    %c0_1 = arith.constant 0 : index
    %c0_2 = arith.constant 0 : index
    %c0_3 = arith.constant 0 : index
    %1 = vector.load %arg3[%c0_1, %c0_2, %c0_3] : memref<1x16x512xbf16, #tpu.memory_space<vmem>>, vector<1x16x512xbf16>
    %2 = vector.shape_cast %1 : vector<1x16x512xbf16> to vector<16x512xbf16>
    %cst = arith.constant dense<0.000000e+00> : vector<128x512xf32>
    %3 = tpu.matmul %0, %2, %cst {dimension_numbers = #tpu.dot_dimension_numbers<[1], [0], [0], [1], [0, 0, 1, 1], [], []>} : vector<128x16xbf16>, vector<16x512xbf16>, vector<128x512xf32> -> vector<128x512xf32>
    %4 = arith.truncf %3 : vector<128x512xf32> to vector<128x512xbf16>
    %c0_4 = arith.constant 0 : index
    %c0_5 = arith.constant 0 : index
    %5 = vector.load %arg5[%c0_4, %c0_5] : memref<128x512xbf16, #tpu.memory_space<vmem>>, vector<128x512xbf16>
    tpu.vector_store %arg5[%c0_4, %c0_5], %4 {strides = array<i32>} : memref<128x512xbf16, #tpu.memory_space<vmem>>, vector<128x512xbf16>,
    %c0_6 = arith.constant 0 : index
    %c0_7 = arith.constant 0 : index
    %6 = vector.load %arg5[%c0_6, %c0_7] : memref<128x512xbf16, #tpu.memory_space<vmem>>, vector<16x128xbf16>
    %c0_8 = arith.constant 0 : index
    %c0_9 = arith.constant 0 : index
    %7 = vector.load %arg6[%c0_8, %c0_9] : memref<16x1024xbf16, #tpu.memory_space<vmem>>, vector<16x128xbf16>
    tpu.vector_store %arg6[%c0_8, %c0_9], %6 {strides = array<i32>} : memref<16x1024xbf16, #tpu.memory_space<vmem>>, vector<16x128xbf16>,
    %c16 = arith.constant 16 : index
    %c0_10 = arith.constant 0 : index
    %8 = vector.load %arg5[%c16, %c0_10] : memref<128x512xbf16, #tpu.memory_space<vmem>>, vector<16x128xbf16>
    %c0_11 = arith.constant 0 : index
    %c128 = arith.constant 128 : index
    %9 = vector.load %arg6[%c0_11, %c128] : memref<16x1024xbf16, #tpu.memory_space<vmem>>, vector<16x128xbf16>
    tpu.vector_store %arg6[%c0_11, %c128], %8 {strides = array<i32>} : memref<16x1024xbf16, #tpu.memory_space<vmem>>, vector<16x128xbf16>,
    %c32 = arith.constant 32 : index
    %c0_12 = arith.constant 0 : index
    %10 = vector.load %arg5[%c32, %c0_12] : memref<128x512xbf16, #tpu.memory_space<vmem>>, vector<16x128xbf16>
    %c0_13 = arith.constant 0 : index
    %c256 = arith.constant 256 : index
    %11 = vector.load %arg6[%c0_13, %c256] : memref<16x1024xbf16, #tpu.memory_space<vmem>>, vector<16x128xbf16>
    tpu.vector_store %arg6[%c0_13, %c256], %10 {strides = array<i32>} : memref<16x1024xbf16, #tpu.memory_space<vmem>>, vector<16x128xbf16>,
    %c48 = arith.constant 48 : index
    %c0_14 = arith.constant 0 : index
    %12 = vector.load %arg5[%c48, %c0_14] : memref<128x512xbf16, #tpu.memory_space<vmem>>, vector<16x128xbf16>
    %c0_15 = arith.constant 0 : index
    %c384 = arith.constant 384 : index
    %13 = vector.load %arg6[%c0_15, %c384] : memref<16x1024xbf16, #tpu.memory_space<vmem>>, vector<16x128xbf16>
    tpu.vector_store %arg6[%c0_15, %c384], %12 {strides = array<i32>} : memref<16x1024xbf16, #tpu.memory_space<vmem>>, vector<16x128xbf16>,
    %c64 = arith.constant 64 : index
    %c0_16 = arith.constant 0 : index
    %14 = vector.load %arg5[%c64, %c0_16] : memref<128x512xbf16, #tpu.memory_space<vmem>>, vector<16x128xbf16>
    %c0_17 = arith.constant 0 : index
    %c512 = arith.constant 512 : index
    %15 = vector.load %arg6[%c0_17, %c512] : memref<16x1024xbf16, #tpu.memory_space<vmem>>, vector<16x128xbf16>
    tpu.vector_store %arg6[%c0_17, %c512], %14 {strides = array<i32>} : memref<16x1024xbf16, #tpu.memory_space<vmem>>, vector<16x128xbf16>,
    %c80 = arith.constant 80 : index
    %c0_18 = arith.constant 0 : index
    %16 = vector.load %arg5[%c80, %c0_18] : memref<128x512xbf16, #tpu.memory_space<vmem>>, vector<16x128xbf16>
    %c0_19 = arith.constant 0 : index
    %c640 = arith.constant 640 : index
    %17 = vector.load %arg6[%c0_19, %c640] : memref<16x1024xbf16, #tpu.memory_space<vmem>>, vector<16x128xbf16>
    tpu.vector_store %arg6[%c0_19, %c640], %16 {strides = array<i32>} : memref<16x1024xbf16, #tpu.memory_space<vmem>>, vector<16x128xbf16>,
    %c96 = arith.constant 96 : index
    %c0_20 = arith.constant 0 : index
    %18 = vector.load %arg5[%c96, %c0_20] : memref<128x512xbf16, #tpu.memory_space<vmem>>, vector<16x128xbf16>
    %c0_21 = arith.constant 0 : index
    %c768 = arith.constant 768 : index
    %19 = vector.load %arg6[%c0_21, %c768] : memref<16x1024xbf16, #tpu.memory_space<vmem>>, vector<16x128xbf16>
    tpu.vector_store %arg6[%c0_21, %c768], %18 {strides = array<i32>} : memref<16x1024xbf16, #tpu.memory_space<vmem>>, vector<16x128xbf16>,
    %c112 = arith.constant 112 : index
    %c0_22 = arith.constant 0 : index
    %20 = vector.load %arg5[%c112, %c0_22] : memref<128x512xbf16, #tpu.memory_space<vmem>>, vector<16x128xbf16>
    %c0_23 = arith.constant 0 : index
    %c896 = arith.constant 896 : index
    %21 = vector.load %arg6[%c0_23, %c896] : memref<16x1024xbf16, #tpu.memory_space<vmem>>, vector<16x128xbf16>
    tpu.vector_store %arg6[%c0_23, %c896], %20 {strides = array<i32>} : memref<16x1024xbf16, #tpu.memory_space<vmem>>, vector<16x128xbf16>,
    %c0_24 = arith.constant 0 : index
    %c0_25 = arith.constant 0 : index
    %c0_26 = arith.constant 0 : index
    %22 = vector.load %arg1[%c0_24, %c0_25, %c0_26] : memref<4x8x16xbf16, #tpu.memory_space<vmem>>, vector<1x8x16xbf16>
    %23 = vector.shape_cast %22 : vector<1x8x16xbf16> to vector<8x16xbf16>
    %c0_27 = arith.constant 0 : index
    %c0_28 = arith.constant 0 : index
    %24 = vector.load %arg6[%c0_27, %c0_28] : memref<16x1024xbf16, #tpu.memory_space<vmem>>, vector<16x1024xbf16>
    %cst_29 = arith.constant dense<0.000000e+00> : vector<8x1024xf32>
    %25 = tpu.matmul %23, %24, %cst_29 {dimension_numbers = #tpu.dot_dimension_numbers<[1], [0], [0], [1], [0, 0, 1, 1], [], []>} : vector<8x16xbf16>, vector<16x1024xbf16>, vector<8x1024xf32> -> vector<8x1024xf32>
    %c0_30 = arith.constant 0 : index
    %c0_31 = arith.constant 0 : index
    %c0_32 = arith.constant 0 : index
    %26 = vector.load %arg4[%c0_30, %c0_31, %c0_32] : memref<4x8x1024xf32, #tpu.memory_space<vmem>>, vector<1x8x1024xf32>
    %27 = vector.shape_cast %26 : vector<1x8x1024xf32> to vector<8x1024xf32>
    %28 = vector.shape_cast %25 : vector<8x1024xf32> to vector<1x8x1024xf32>
    tpu.vector_store %arg4[%c0_30, %c0_31, %c0_32], %28 {strides = array<i32>} : memref<4x8x1024xf32, #tpu.memory_space<vmem>>, vector<1x8x1024xf32>,
    %c0_33 = arith.constant 0 : index
    %c128_34 = arith.constant 128 : index
    %29 = vector.load %arg5[%c0_33, %c128_34] : memref<128x512xbf16, #tpu.memory_space<vmem>>, vector<16x128xbf16>
    %c0_35 = arith.constant 0 : index
    %c0_36 = arith.constant 0 : index
    %30 = vector.load %arg6[%c0_35, %c0_36] : memref<16x1024xbf16, #tpu.memory_space<vmem>>, vector<16x128xbf16>
    tpu.vector_store %arg6[%c0_35, %c0_36], %29 {strides = array<i32>} : memref<16x1024xbf16, #tpu.memory_space<vmem>>, vector<16x128xbf16>,
    %c16_37 = arith.constant 16 : index
    %c128_38 = arith.constant 128 : index
    %31 = vector.load %arg5[%c16_37, %c128_38] : memref<128x512xbf16, #tpu.memory_space<vmem>>, vector<16x128xbf16>
    %c0_39 = arith.constant 0 : index
    %c128_40 = arith.constant 128 : index
    %32 = vector.load %arg6[%c0_39, %c128_40] : memref<16x1024xbf16, #tpu.memory_space<vmem>>, vector<16x128xbf16>
    tpu.vector_store %arg6[%c0_39, %c128_40], %31 {strides = array<i32>} : memref<16x1024xbf16, #tpu.memory_space<vmem>>, vector<16x128xbf16>,
    %c32_41 = arith.constant 32 : index
    %c128_42 = arith.constant 128 : index
    %33 = vector.load %arg5[%c32_41, %c128_42] : memref<128x512xbf16, #tpu.memory_space<vmem>>, vector<16x128xbf16>
    %c0_43 = arith.constant 0 : index
    %c256_44 = arith.constant 256 : index
    %34 = vector.load %arg6[%c0_43, %c256_44] : memref<16x1024xbf16, #tpu.memory_space<vmem>>, vector<16x128xbf16>
    tpu.vector_store %arg6[%c0_43, %c256_44], %33 {strides = array<i32>} : memref<16x1024xbf16, #tpu.memory_space<vmem>>, vector<16x128xbf16>,
    %c48_45 = arith.constant 48 : index
    %c128_46 = arith.constant 128 : index
    %35 = vector.load %arg5[%c48_45, %c128_46] : memref<128x512xbf16, #tpu.memory_space<vmem>>, vector<16x128xbf16>
    %c0_47 = arith.constant 0 : index
    %c384_48 = arith.constant 384 : index
    %36 = vector.load %arg6[%c0_47, %c384_48] : memref<16x1024xbf16, #tpu.memory_space<vmem>>, vector<16x128xbf16>
    tpu.vector_store %arg6[%c0_47, %c384_48], %35 {strides = array<i32>} : memref<16x1024xbf16, #tpu.memory_space<vmem>>, vector<16x128xbf16>,
    %c64_49 = arith.constant 64 : index
    %c128_50 = arith.constant 128 : index
    %37 = vector.load %arg5[%c64_49, %c128_50] : memref<128x512xbf16, #tpu.memory_space<vmem>>, vector<16x128xbf16>
    %c0_51 = arith.constant 0 : index
    %c512_52 = arith.constant 512 : index
    %38 = vector.load %arg6[%c0_51, %c512_52] : memref<16x1024xbf16, #tpu.memory_space<vmem>>, vector<16x128xbf16>
    tpu.vector_store %arg6[%c0_51, %c512_52], %37 {strides = array<i32>} : memref<16x1024xbf16, #tpu.memory_space<vmem>>, vector<16x128xbf16>,
    %c80_53 = arith.constant 80 : index
    %c128_54 = arith.constant 128 : index
    %39 = vector.load %arg5[%c80_53, %c128_54] : memref<128x512xbf16, #tpu.memory_space<vmem>>, vector<16x128xbf16>
    %c0_55 = arith.constant 0 : index
    %c640_56 = arith.constant 640 : index
    %40 = vector.load %arg6[%c0_55, %c640_56] : memref<16x1024xbf16, #tpu.memory_space<vmem>>, vector<16x128xbf16>
    tpu.vector_store %arg6[%c0_55, %c640_56], %39 {strides = array<i32>} : memref<16x1024xbf16, #tpu.memory_space<vmem>>, vector<16x128xbf16>,
    %c96_57 = arith.constant 96 : index
    %c128_58 = arith.constant 128 : index
    %41 = vector.load %arg5[%c96_57, %c128_58] : memref<128x512xbf16, #tpu.memory_space<vmem>>, vector<16x128xbf16>
    %c0_59 = arith.constant 0 : index
    %c768_60 = arith.constant 768 : index
    %42 = vector.load %arg6[%c0_59, %c768_60] : memref<16x1024xbf16, #tpu.memory_space<vmem>>, vector<16x128xbf16>
    tpu.vector_store %arg6[%c0_59, %c768_60], %41 {strides = array<i32>} : memref<16x1024xbf16, #tpu.memory_space<vmem>>, vector<16x128xbf16>,
    %c112_61 = arith.constant 112 : index
    %c128_62 = arith.constant 128 : index
    %43 = vector.load %arg5[%c112_61, %c128_62] : memref<128x512xbf16, #tpu.memory_space<vmem>>, vector<16x128xbf16>
    %c0_63 = arith.constant 0 : index
    %c896_64 = arith.constant 896 : index
    %44 = vector.load %arg6[%c0_63, %c896_64] : memref<16x1024xbf16, #tpu.memory_space<vmem>>, vector<16x128xbf16>
    tpu.vector_store %arg6[%c0_63, %c896_64], %43 {strides = array<i32>} : memref<16x1024xbf16, #tpu.memory_space<vmem>>, vector<16x128xbf16>,
    %c1 = arith.constant 1 : index
    %c0_65 = arith.constant 0 : index
    %c0_66 = arith.constant 0 : index
    %45 = vector.load %arg1[%c1, %c0_65, %c0_66] : memref<4x8x16xbf16, #tpu.memory_space<vmem>>, vector<1x8x16xbf16>
    %46 = vector.shape_cast %45 : vector<1x8x16xbf16> to vector<8x16xbf16>
    %c0_67 = arith.constant 0 : index
    %c0_68 = arith.constant 0 : index
    %47 = vector.load %arg6[%c0_67, %c0_68] : memref<16x1024xbf16, #tpu.memory_space<vmem>>, vector<16x1024xbf16>
    %cst_69 = arith.constant dense<0.000000e+00> : vector<8x1024xf32>
    %48 = tpu.matmul %46, %47, %cst_69 {dimension_numbers = #tpu.dot_dimension_numbers<[1], [0], [0], [1], [0, 0, 1, 1], [], []>} : vector<8x16xbf16>, vector<16x1024xbf16>, vector<8x1024xf32> -> vector<8x1024xf32>
    %c1_70 = arith.constant 1 : index
    %c0_71 = arith.constant 0 : index
    %c0_72 = arith.constant 0 : index
    %49 = vector.load %arg4[%c1_70, %c0_71, %c0_72] : memref<4x8x1024xf32, #tpu.memory_space<vmem>>, vector<1x8x1024xf32>
    %50 = vector.shape_cast %49 : vector<1x8x1024xf32> to vector<8x1024xf32>
    %51 = vector.shape_cast %48 : vector<8x1024xf32> to vector<1x8x1024xf32>
    tpu.vector_store %arg4[%c1_70, %c0_71, %c0_72], %51 {strides = array<i32>} : memref<4x8x1024xf32, #tpu.memory_space<vmem>>, vector<1x8x1024xf32>,
    %c0_73 = arith.constant 0 : index
    %c256_74 = arith.constant 256 : index
    %52 = vector.load %arg5[%c0_73, %c256_74] : memref<128x512xbf16, #tpu.memory_space<vmem>>, vector<16x128xbf16>
    %c0_75 = arith.constant 0 : index
    %c0_76 = arith.constant 0 : index
    %53 = vector.load %arg6[%c0_75, %c0_76] : memref<16x1024xbf16, #tpu.memory_space<vmem>>, vector<16x128xbf16>
    tpu.vector_store %arg6[%c0_75, %c0_76], %52 {strides = array<i32>} : memref<16x1024xbf16, #tpu.memory_space<vmem>>, vector<16x128xbf16>,
    %c16_77 = arith.constant 16 : index
    %c256_78 = arith.constant 256 : index
    %54 = vector.load %arg5[%c16_77, %c256_78] : memref<128x512xbf16, #tpu.memory_space<vmem>>, vector<16x128xbf16>
    %c0_79 = arith.constant 0 : index
    %c128_80 = arith.constant 128 : index
    %55 = vector.load %arg6[%c0_79, %c128_80] : memref<16x1024xbf16, #tpu.memory_space<vmem>>, vector<16x128xbf16>
    tpu.vector_store %arg6[%c0_79, %c128_80], %54 {strides = array<i32>} : memref<16x1024xbf16, #tpu.memory_space<vmem>>, vector<16x128xbf16>,
    %c32_81 = arith.constant 32 : index
    %c256_82 = arith.constant 256 : index
    %56 = vector.load %arg5[%c32_81, %c256_82] : memref<128x512xbf16, #tpu.memory_space<vmem>>, vector<16x128xbf16>
    %c0_83 = arith.constant 0 : index
    %c256_84 = arith.constant 256 : index
    %57 = vector.load %arg6[%c0_83, %c256_84] : memref<16x1024xbf16, #tpu.memory_space<vmem>>, vector<16x128xbf16>
    tpu.vector_store %arg6[%c0_83, %c256_84], %56 {strides = array<i32>} : memref<16x1024xbf16, #tpu.memory_space<vmem>>, vector<16x128xbf16>,
    %c48_85 = arith.constant 48 : index
    %c256_86 = arith.constant 256 : index
    %58 = vector.load %arg5[%c48_85, %c256_86] : memref<128x512xbf16, #tpu.memory_space<vmem>>, vector<16x128xbf16>
    %c0_87 = arith.constant 0 : index
    %c384_88 = arith.constant 384 : index
    %59 = vector.load %arg6[%c0_87, %c384_88] : memref<16x1024xbf16, #tpu.memory_space<vmem>>, vector<16x128xbf16>
    tpu.vector_store %arg6[%c0_87, %c384_88], %58 {strides = array<i32>} : memref<16x1024xbf16, #tpu.memory_space<vmem>>, vector<16x128xbf16>,
    %c64_89 = arith.constant 64 : index
    %c256_90 = arith.constant 256 : index
    %60 = vector.load %arg5[%c64_89, %c256_90] : memref<128x512xbf16, #tpu.memory_space<vmem>>, vector<16x128xbf16>
    %c0_91 = arith.constant 0 : index
    %c512_92 = arith.constant 512 : index
    %61 = vector.load %arg6[%c0_91, %c512_92] : memref<16x1024xbf16, #tpu.memory_space<vmem>>, vector<16x128xbf16>
    tpu.vector_store %arg6[%c0_91, %c512_92], %60 {strides = array<i32>} : memref<16x1024xbf16, #tpu.memory_space<vmem>>, vector<16x128xbf16>,
    %c80_93 = arith.constant 80 : index
    %c256_94 = arith.constant 256 : index
    %62 = vector.load %arg5[%c80_93, %c256_94] : memref<128x512xbf16, #tpu.memory_space<vmem>>, vector<16x128xbf16>
    %c0_95 = arith.constant 0 : index
    %c640_96 = arith.constant 640 : index
    %63 = vector.load %arg6[%c0_95, %c640_96] : memref<16x1024xbf16, #tpu.memory_space<vmem>>, vector<16x128xbf16>
    tpu.vector_store %arg6[%c0_95, %c640_96], %62 {strides = array<i32>} : memref<16x1024xbf16, #tpu.memory_space<vmem>>, vector<16x128xbf16>,
    %c96_97 = arith.constant 96 : index
    %c256_98 = arith.constant 256 : index
    %64 = vector.load %arg5[%c96_97, %c256_98] : memref<128x512xbf16, #tpu.memory_space<vmem>>, vector<16x128xbf16>
    %c0_99 = arith.constant 0 : index
    %c768_100 = arith.constant 768 : index
    %65 = vector.load %arg6[%c0_99, %c768_100] : memref<16x1024xbf16, #tpu.memory_space<vmem>>, vector<16x128xbf16>
    tpu.vector_store %arg6[%c0_99, %c768_100], %64 {strides = array<i32>} : memref<16x1024xbf16, #tpu.memory_space<vmem>>, vector<16x128xbf16>,
    %c112_101 = arith.constant 112 : index
    %c256_102 = arith.constant 256 : index
    %66 = vector.load %arg5[%c112_101, %c256_102] : memref<128x512xbf16, #tpu.memory_space<vmem>>, vector<16x128xbf16>
    %c0_103 = arith.constant 0 : index
    %c896_104 = arith.constant 896 : index
    %67 = vector.load %arg6[%c0_103, %c896_104] : memref<16x1024xbf16, #tpu.memory_space<vmem>>, vector<16x128xbf16>
    tpu.vector_store %arg6[%c0_103, %c896_104], %66 {strides = array<i32>} : memref<16x1024xbf16, #tpu.memory_space<vmem>>, vector<16x128xbf16>,
    %c2 = arith.constant 2 : index
    %c0_105 = arith.constant 0 : index
    %c0_106 = arith.constant 0 : index
    %68 = vector.load %arg1[%c2, %c0_105, %c0_106] : memref<4x8x16xbf16, #tpu.memory_space<vmem>>, vector<1x8x16xbf16>
    %69 = vector.shape_cast %68 : vector<1x8x16xbf16> to vector<8x16xbf16>
    %c0_107 = arith.constant 0 : index
    %c0_108 = arith.constant 0 : index
    %70 = vector.load %arg6[%c0_107, %c0_108] : memref<16x1024xbf16, #tpu.memory_space<vmem>>, vector<16x1024xbf16>
    %cst_109 = arith.constant dense<0.000000e+00> : vector<8x1024xf32>
    %71 = tpu.matmul %69, %70, %cst_109 {dimension_numbers = #tpu.dot_dimension_numbers<[1], [0], [0], [1], [0, 0, 1, 1], [], []>} : vector<8x16xbf16>, vector<16x1024xbf16>, vector<8x1024xf32> -> vector<8x1024xf32>
    %c2_110 = arith.constant 2 : index
    %c0_111 = arith.constant 0 : index
    %c0_112 = arith.constant 0 : index
    %72 = vector.load %arg4[%c2_110, %c0_111, %c0_112] : memref<4x8x1024xf32, #tpu.memory_space<vmem>>, vector<1x8x1024xf32>
    %73 = vector.shape_cast %72 : vector<1x8x1024xf32> to vector<8x1024xf32>
    %74 = vector.shape_cast %71 : vector<8x1024xf32> to vector<1x8x1024xf32>
    tpu.vector_store %arg4[%c2_110, %c0_111, %c0_112], %74 {strides = array<i32>} : memref<4x8x1024xf32, #tpu.memory_space<vmem>>, vector<1x8x1024xf32>,
    %c0_113 = arith.constant 0 : index
    %c384_114 = arith.constant 384 : index
    %75 = vector.load %arg5[%c0_113, %c384_114] : memref<128x512xbf16, #tpu.memory_space<vmem>>, vector<16x128xbf16>
    %c0_115 = arith.constant 0 : index
    %c0_116 = arith.constant 0 : index
    %76 = vector.load %arg6[%c0_115, %c0_116] : memref<16x1024xbf16, #tpu.memory_space<vmem>>, vector<16x128xbf16>
    tpu.vector_store %arg6[%c0_115, %c0_116], %75 {strides = array<i32>} : memref<16x1024xbf16, #tpu.memory_space<vmem>>, vector<16x128xbf16>,
    %c16_117 = arith.constant 16 : index
    %c384_118 = arith.constant 384 : index
    %77 = vector.load %arg5[%c16_117, %c384_118] : memref<128x512xbf16, #tpu.memory_space<vmem>>, vector<16x128xbf16>
    %c0_119 = arith.constant 0 : index
    %c128_120 = arith.constant 128 : index
    %78 = vector.load %arg6[%c0_119, %c128_120] : memref<16x1024xbf16, #tpu.memory_space<vmem>>, vector<16x128xbf16>
    tpu.vector_store %arg6[%c0_119, %c128_120], %77 {strides = array<i32>} : memref<16x1024xbf16, #tpu.memory_space<vmem>>, vector<16x128xbf16>,
    %c32_121 = arith.constant 32 : index
    %c384_122 = arith.constant 384 : index
    %79 = vector.load %arg5[%c32_121, %c384_122] : memref<128x512xbf16, #tpu.memory_space<vmem>>, vector<16x128xbf16>
    %c0_123 = arith.constant 0 : index
    %c256_124 = arith.constant 256 : index
    %80 = vector.load %arg6[%c0_123, %c256_124] : memref<16x1024xbf16, #tpu.memory_space<vmem>>, vector<16x128xbf16>
    tpu.vector_store %arg6[%c0_123, %c256_124], %79 {strides = array<i32>} : memref<16x1024xbf16, #tpu.memory_space<vmem>>, vector<16x128xbf16>,
    %c48_125 = arith.constant 48 : index
    %c384_126 = arith.constant 384 : index
    %81 = vector.load %arg5[%c48_125, %c384_126] : memref<128x512xbf16, #tpu.memory_space<vmem>>, vector<16x128xbf16>
    %c0_127 = arith.constant 0 : index
    %c384_128 = arith.constant 384 : index
    %82 = vector.load %arg6[%c0_127, %c384_128] : memref<16x1024xbf16, #tpu.memory_space<vmem>>, vector<16x128xbf16>
    tpu.vector_store %arg6[%c0_127, %c384_128], %81 {strides = array<i32>} : memref<16x1024xbf16, #tpu.memory_space<vmem>>, vector<16x128xbf16>,
    %c64_129 = arith.constant 64 : index
    %c384_130 = arith.constant 384 : index
    %83 = vector.load %arg5[%c64_129, %c384_130] : memref<128x512xbf16, #tpu.memory_space<vmem>>, vector<16x128xbf16>
    %c0_131 = arith.constant 0 : index
    %c512_132 = arith.constant 512 : index
    %84 = vector.load %arg6[%c0_131, %c512_132] : memref<16x1024xbf16, #tpu.memory_space<vmem>>, vector<16x128xbf16>
    tpu.vector_store %arg6[%c0_131, %c512_132], %83 {strides = array<i32>} : memref<16x1024xbf16, #tpu.memory_space<vmem>>, vector<16x128xbf16>,
    %c80_133 = arith.constant 80 : index
    %c384_134 = arith.constant 384 : index
    %85 = vector.load %arg5[%c80_133, %c384_134] : memref<128x512xbf16, #tpu.memory_space<vmem>>, vector<16x128xbf16>
    %c0_135 = arith.constant 0 : index
    %c640_136 = arith.constant 640 : index
    %86 = vector.load %arg6[%c0_135, %c640_136] : memref<16x1024xbf16, #tpu.memory_space<vmem>>, vector<16x128xbf16>
    tpu.vector_store %arg6[%c0_135, %c640_136], %85 {strides = array<i32>} : memref<16x1024xbf16, #tpu.memory_space<vmem>>, vector<16x128xbf16>,
    %c96_137 = arith.constant 96 : index
    %c384_138 = arith.constant 384 : index
    %87 = vector.load %arg5[%c96_137, %c384_138] : memref<128x512xbf16, #tpu.memory_space<vmem>>, vector<16x128xbf16>
    %c0_139 = arith.constant 0 : index
    %c768_140 = arith.constant 768 : index
    %88 = vector.load %arg6[%c0_139, %c768_140] : memref<16x1024xbf16, #tpu.memory_space<vmem>>, vector<16x128xbf16>
    tpu.vector_store %arg6[%c0_139, %c768_140], %87 {strides = array<i32>} : memref<16x1024xbf16, #tpu.memory_space<vmem>>, vector<16x128xbf16>,
    %c112_141 = arith.constant 112 : index
    %c384_142 = arith.constant 384 : index
    %89 = vector.load %arg5[%c112_141, %c384_142] : memref<128x512xbf16, #tpu.memory_space<vmem>>, vector<16x128xbf16>
    %c0_143 = arith.constant 0 : index
    %c896_144 = arith.constant 896 : index
    %90 = vector.load %arg6[%c0_143, %c896_144] : memref<16x1024xbf16, #tpu.memory_space<vmem>>, vector<16x128xbf16>
    tpu.vector_store %arg6[%c0_143, %c896_144], %89 {strides = array<i32>} : memref<16x1024xbf16, #tpu.memory_space<vmem>>, vector<16x128xbf16>,
    %c3 = arith.constant 3 : index
    %c0_145 = arith.constant 0 : index
    %c0_146 = arith.constant 0 : index
    %91 = vector.load %arg1[%c3, %c0_145, %c0_146] : memref<4x8x16xbf16, #tpu.memory_space<vmem>>, vector<1x8x16xbf16>
    %92 = vector.shape_cast %91 : vector<1x8x16xbf16> to vector<8x16xbf16>
    %c0_147 = arith.constant 0 : index
    %c0_148 = arith.constant 0 : index
    %93 = vector.load %arg6[%c0_147, %c0_148] : memref<16x1024xbf16, #tpu.memory_space<vmem>>, vector<16x1024xbf16>
    %cst_149 = arith.constant dense<0.000000e+00> : vector<8x1024xf32>
    %94 = tpu.matmul %92, %93, %cst_149 {dimension_numbers = #tpu.dot_dimension_numbers<[1], [0], [0], [1], [0, 0, 1, 1], [], []>} : vector<8x16xbf16>, vector<16x1024xbf16>, vector<8x1024xf32> -> vector<8x1024xf32>
    %c3_150 = arith.constant 3 : index
    %c0_151 = arith.constant 0 : index
    %c0_152 = arith.constant 0 : index
    %95 = vector.load %arg4[%c3_150, %c0_151, %c0_152] : memref<4x8x1024xf32, #tpu.memory_space<vmem>>, vector<1x8x1024xf32>
    %96 = vector.shape_cast %95 : vector<1x8x1024xf32> to vector<8x1024xf32>
    %97 = vector.shape_cast %94 : vector<8x1024xf32> to vector<1x8x1024xf32>
    tpu.vector_store %arg4[%c3_150, %c0_151, %c0_152], %97 {strides = array<i32>} : memref<4x8x1024xf32, #tpu.memory_space<vmem>>, vector<1x8x1024xf32>,
    return
  }
  func.func @transform_0(%arg0: i32) -> (i32, i32, i32) {
    %c0_i32 = arith.constant 0 : i32
    %c0_i32_0 = arith.constant 0 : i32
    %c0_i32_1 = arith.constant 0 : i32
    return %arg0, %c0_i32, %c0_i32_0 : i32, i32, i32
  }
  func.func @transform_1(%arg0: i32) -> (i32, i32) {
    %c0_i32 = arith.constant 0 : i32
    %c0_i32_0 = arith.constant 0 : i32
    %c0_i32_1 = arith.constant 0 : i32
    return %c0_i32, %c0_i32_0 : i32, i32
  }
  func.func @transform_2(%arg0: i32) -> (i32, i32, i32) {
    %c0_i32 = arith.constant 0 : i32
    %c0_i32_0 = arith.constant 0 : i32
    %c0_i32_1 = arith.constant 0 : i32
    return %arg0, %c0_i32, %c0_i32_0 : i32, i32, i32
  }
  func.func @transform_3(%arg0: i32) -> (i32, i32, i32) {
    %c0_i32 = arith.constant 0 : i32
    %c0_i32_0 = arith.constant 0 : i32
    %c0_i32_1 = arith.constant 0 : i32
    return %arg0, %c0_i32, %c0_i32_0 : i32, i32, i32
  }
}

</mosaic_0001>

<bundles_post_ra>
// kernel: tpu_custom_call.1
= control target key start
LH: loop header
LB: loop body
LE: loop exit
PB: predicated region body
PF: predicated region fallthrough
CT: control target
= control target key end

     0   :  { %v1322_v2 = vmov 0   ;;  %vm96_vm0 = vcmask 130048   ;;  %s1602_s0 = inlined_call_operand.vmem [shape: bf16[4,8,16], index: 0, kind: input, shape index: {}]   ;;  %s1603_s1 = inlined_call_operand.vmem [shape: bf16[128,16], index: 1, kind: input, shape index: {}]   ;;  %s1604_s2 = inlined_call_operand.vmem [shape: bf16[1,16,512], index: 2, kind: input, shape index: {}]   ;;  %s1605_s3 = inlined_call_operand.hbm [shape: f32[4,8,1024], index: 3, kind: output, shape index: {}]  }
   0x1   :  { %v1284_v0 = vld [vmem:[%s1604_s2 + $0x4] ss:$16 sps:$4 sm:$0xff]   ;;  %v1286_v1 = vld [vmem:[%s1604_s2] ss:$16 sps:$4 sm:$0xff]   ;;  %153 = vmatprep.mubr.bf16.mxu0 %v1322_v2  ;;  %266 = vmatprep.mubr.bf16.mxu1 %v1322_v2  ;;  %v1291_v4 = vld [vmem:[%s1604_s2 + $0xc] ss:$16 sps:$4 sm:$0xff]  }
   0x2   :  { %121 = vmatprep.subr.bf16.mxu0 %v1284_v0  ;;  %v1287_v3 = vld [vmem:[%s1603_s1] sm:$0xff]   ;;  %v1293_v5 = vld [vmem:[%s1604_s2 + $0x8] ss:$16 sps:$4 sm:$0xff]   ;;  %234 = vmatprep.subr.bf16.mxu1 %v1291_v4 }
   0x3   :  { %122 = vmatpush1.bf16.msra.mxu0 %v1286_v1  ;;  %235 = vmatpush1.bf16.msra.mxu1 %v1293_v5  ;;  %v1288_v6 = vld [vmem:[%s1603_s1 + $0x8] sm:$0xff]  }
   0x6   :  { %1245 = vmatmul.mubr.msk.bf16.vlgmr.msra.gmra.mrb[0].mxu0 %vm96_vm0, %v1287_v3 }
   0x7   :  { %163 = vmatprep.mubr.bf16.mxu0 %v1322_v2 }
   0x8   :  { %8 = vsyncpa [#allocation5], 0  ;;  %1253 = vmatmul.mubr.msk.bf16.vlgmr.msra.gmra.mrb[0].mxu1 %vm96_vm0, %v1287_v3  ;;  %v1289_v7 = vld [vmem:[%s1603_s1 + $0x10] sm:$0xff]   ;;  %v1290_v8 = vld [vmem:[%s1603_s1 + $0x18] sm:$0xff]  }
   0x9   :  { %276 = vmatprep.mubr.bf16.mxu1 %v1322_v2  ;;  %v1294_v9 = vld [vmem:[%s1603_s1 + $0x20] sm:$0xff]   ;;  %v1295_v10 = vld [vmem:[%s1603_s1 + $0x28] sm:$0xff]   ;;  %v1296_v11 = vld [vmem:[%s1603_s1 + $0x30] sm:$0xff]  }
   0xa   :  { %v1297_v12 = vld [vmem:[%s1603_s1 + $0x38] sm:$0xff]   ;;  %v1440_v31 = vld [vmem:[%s1602_s0] sm:$0xf] }
   0xe   :  { %1246 = vmatmul.mubr.msk.bf16.gmra.mrb[4].mxu0 %vm96_vm0, %v1288_v6 }
   0xf   :  { %173 = vmatprep.mubr.bf16.mxu0 %v1322_v2 }
  0x10   :  { %1254 = vmatmul.mubr.msk.bf16.gmra.mrb[4].mxu1 %vm96_vm0, %v1288_v6 }
  0x11   :  { %286 = vmatprep.mubr.bf16.mxu1 %v1322_v2 }
  0x16   :  { %1247 = vmatmul.mubr.msk.bf16.gmra.mrb[8].mxu0 %vm96_vm0, %v1289_v7 }
  0x17   :  { %183 = vmatprep.mubr.bf16.mxu0 %v1322_v2 }
  0x18   :  { %1255 = vmatmul.mubr.msk.bf16.gmra.mrb[8].mxu1 %vm96_vm0, %v1289_v7 }
  0x19   :  { %296 = vmatprep.mubr.bf16.mxu1 %v1322_v2 }
  0x1e   :  { %1248 = vmatmul.mubr.msk.bf16.gmra.mrb[12].mxu0 %vm96_vm0, %v1290_v8 }
  0x1f   :  { %193 = vmatprep.mubr.bf16.mxu0 %v1322_v2 }
  0x20   :  { %1256 = vmatmul.mubr.msk.bf16.gmra.mrb[12].mxu1 %vm96_vm0, %v1290_v8 }
  0x21   :  { %306 = vmatprep.mubr.bf16.mxu1 %v1322_v2 }
  0x26   :  { %1249 = vmatmul.mubr.msk.bf16.gmra.mrb[16].mxu0 %vm96_vm0, %v1294_v9 }
  0x27   :  { %203 = vmatprep.mubr.bf16.mxu0 %v1322_v2 }
  0x28   :  { %1257 = vmatmul.mubr.msk.bf16.gmra.mrb[16].mxu1 %vm96_vm0, %v1294_v9 }
  0x29   :  { %316 = vmatprep.mubr.bf16.mxu1 %v1322_v2 }
  0x2e   :  { %1250 = vmatmul.mubr.msk.bf16.gmra.mrb[20].mxu0 %vm96_vm0, %v1295_v10 }
  0x2f   :  { %213 = vmatprep.mubr.bf16.mxu0 %v1322_v2 }
  0x30   :  { %1258 = vmatmul.mubr.msk.bf16.gmra.mrb[20].mxu1 %vm96_vm0, %v1295_v10 }
  0x31   :  { %326 = vmatprep.mubr.bf16.mxu1 %v1322_v2 }
  0x36   :  { %1251 = vmatmul.mubr.msk.bf16.gmra.mrb[24].mxu0 %vm96_vm0, %v1296_v11 }
  0x37   :  { %223 = vmatprep.mubr.bf16.mxu0 %v1322_v2 }
  0x38   :  { %1259 = vmatmul.mubr.msk.bf16.gmra.mrb[24].mxu1 %vm96_vm0, %v1296_v11 }
  0x39   :  { %336 = vmatprep.mubr.bf16.mxu1 %v1322_v2 }
  0x3e   :  { %1252 = vmatmul.mubr.msk.bf16.gmra.mrb[28].mxu0 %vm96_vm0, %v1297_v12 }
  0x3f   :  { %471 = vmatprep.mubr.bf16.mxu0 %v1322_v2 }
  0x40   :  { %1260 = vmatmul.mubr.msk.bf16.gmra.mrb[28].mxu1 %vm96_vm0, %v1297_v12 }
  0x41   :  { %512 = vmatprep.mubr.bf16.mxu1 %v1322_v2 }
  0xd9   :  { %v155_v13 = vpop.f32.mrb[0].mxu0 }
  0xda   :  { %v1416_v14 = vpop.f32.mrb[1].mxu0 }
  0xdb   :  { %v159_v15 = vpop.f32.mrb[2].mxu0  ;;  %v1422_v19 = vpop.f32.mrb[0].mxu1 }
  0xdc   :  { %v347_v16 = vpack.c.bf16 %v159_v15, %v155_v13  ;;  %v1418_v17 = vpop.f32.mrb[3].mxu0  ;;  %v1424_v20 = vpop.f32.mrb[1].mxu1 }
  0xdd   :  { %v348_v18 = vpack.c.bf16 %v1418_v17, %v1416_v14  ;;  %v1426_v22 = vpop.f32.mrb[2].mxu1 }
  0xde   :  { %v349_v24 = vpack.c.bf16 %v1426_v22, %v1422_v19  ;;  %v1432_v25 = vpop.f32.mrb[3].mxu1  ;;  %v1275_v19 = vld [vmem:[%s1602_s0 + $0xc] sm:$0xf] }
  0xdf   :  { %v350_v27 = vpack.c.bf16 %v1432_v25, %v1424_v20 }
  0xe1   :  { %v165_v21 = vpop.f32.mrb[4].mxu0 }
  0xe2   :  { %v1428_v23 = vpop.f32.mrb[5].mxu0 }
  0xe3   :  { %v169_v26 = vpop.f32.mrb[6].mxu0  ;;  %v1442_v32 = vpop.f32.mrb[4].mxu1 }
  0xe4   :  { %v351_v28 = vpack.c.bf16 %v169_v26, %v165_v21  ;;  %v171_v29 = vpop.f32.mrb[7].mxu0  ;;  %v1444_v33 = vpop.f32.mrb[5].mxu1 }
  0xe5   :  { %v352_v30 = vpack.c.bf16 %v171_v29, %v1428_v23  ;;  %v1446_v35 = vpop.f32.mrb[6].mxu1 }
  0xe6   :  { %439 = vmatprep.subr.bf16.mxu0 %v351_v28  ;;  %v353_v37 = vpack.c.bf16 %v1446_v35, %v1442_v32  ;;  %v1454_v38 = vpop.f32.mrb[7].mxu1 }
  0xe7   :  { %440 = vmatpush1.bf16.msra.mxu0 %v347_v16  ;;  %v354_v40 = vpack.c.bf16 %v1454_v38, %v1444_v33 }
  0xe9   :  { %v175_v34 = vpop.f32.mrb[8].mxu0 }
  0xea   :  { %v1448_v36 = vpop.f32.mrb[9].mxu0  ;;  %1261 = vmatmul.mubr.msk.bf16.vlgmr.msra.gmra.mrb[32].mxu0 %vm96_vm0, %v1440_v31 }
  0xeb   :  { %v179_v39 = vpop.f32.mrb[10].mxu0  ;;  %553 = vmatprep.mubr.bf16.mxu0 %v1322_v2  ;;  %v1463_v44 = vpop.f32.mrb[8].mxu1 }
  0xec   :  { %v355_v41 = vpack.c.bf16 %v179_v39, %v175_v34  ;;  %v1459_v42 = vpop.f32.mrb[11].mxu0  ;;  %v1465_v45 = vpop.f32.mrb[9].mxu1 }
  0xed   :  { %v356_v43 = vpack.c.bf16 %v1459_v42, %v1448_v36  ;;  %v1467_v47 = vpop.f32.mrb[10].mxu1 }
  0xee   :  { %v357_v49 = vpack.c.bf16 %v1467_v47, %v1463_v44  ;;  %v1473_v50 = vpop.f32.mrb[11].mxu1 }
  0xef   :  { %v358_v52 = vpack.c.bf16 %v1473_v50, %v1465_v45 }
  0xf1   :  { %v185_v46 = vpop.f32.mrb[12].mxu0 }
  0xf2   :  { %v1469_v48 = vpop.f32.mrb[13].mxu0 }
  0xf3   :  { %v189_v51 = vpop.f32.mrb[14].mxu0  ;;  %v1481_v56 = vpop.f32.mrb[12].mxu1 }
  0xf4   :  { %v359_v53 = vpack.c.bf16 %v189_v51, %v185_v46  ;;  %v1477_v54 = vpop.f32.mrb[15].mxu0  ;;  %v1483_v57 = vpop.f32.mrb[13].mxu1 }
  0xf5   :  { %v360_v55 = vpack.c.bf16 %v1477_v54, %v1469_v48  ;;  %v1485_v59 = vpop.f32.mrb[14].mxu1 }
  0xf6   :  { %480 = vmatprep.subr.bf16.mxu1 %v359_v53  ;;  %v361_v61 = vpack.c.bf16 %v1485_v59, %v1481_v56  ;;  %v1491_v62 = vpop.f32.mrb[15].mxu1 }
  0xf7   :  { %481 = vmatpush1.bf16.msra.mxu1 %v355_v41  ;;  %v362_v0 = vpack.c.bf16 %v1491_v62, %v1483_v57 }
  0xf9   :  { %v195_v58 = vpop.f32.mrb[16].mxu0 }
  0xfa   :  { %v197_v60 = vpop.f32.mrb[17].mxu0  ;;  %1262 = vmatmul.mubr.msk.bf16.vlgmr.msra.gmra.mrb[32].mxu1 %vm96_vm0, %v1440_v31 }
  0xfb   :  { %v199_v63 = vpop.f32.mrb[18].mxu0  ;;  %594 = vmatprep.mubr.bf16.mxu1 %v1322_v2  ;;  %v1496_v5 = vpop.f32.mrb[16].mxu1 }
  0xfc   :  { %v363_v1 = vpack.c.bf16 %v199_v63, %v195_v58  ;;  %v201_v3 = vpop.f32.mrb[19].mxu0  ;;  %v1498_v6 = vpop.f32.mrb[17].mxu1 }
  0xfd   :  { %v364_v4 = vpack.c.bf16 %v201_v3, %v197_v60  ;;  %v1500_v8 = vpop.f32.mrb[18].mxu1  ;;  %v1265_v60 = vld [vmem:[%s1602_s0 + $0x4] sm:$0xf] }
  0xfe   :  { %v365_v10 = vpack.c.bf16 %v1500_v8, %v1496_v5  ;;  %v1504_v11 = vpop.f32.mrb[19].mxu1 }
  0xff   :  { %v366_v13 = vpack.c.bf16 %v1504_v11, %v1498_v6 }
 0x101   :  { %v205_v7 = vpop.f32.mrb[20].mxu0 }
 0x102   :  { %v207_v9 = vpop.f32.mrb[21].mxu0 }
 0x103   :  { %v209_v12 = vpop.f32.mrb[22].mxu0  ;;  %v318_v23 = vpop.f32.mrb[20].mxu1 }
 0x104   :  { %v367_v15 = vpack.c.bf16 %v209_v12, %v205_v7  ;;  %v211_v16 = vpop.f32.mrb[23].mxu0  ;;  %v1508_v26 = vpop.f32.mrb[21].mxu1 }
 0x105   :  { %v368_v21 = vpack.c.bf16 %v211_v16, %v207_v9  ;;  %v322_v29 = vpop.f32.mrb[22].mxu1 }
 0x106   :  { %521 = vmatprep.subr.bf16.mxu0 %v367_v15  ;;  %v369_v39 = vpack.c.bf16 %v322_v29, %v318_v23  ;;  %v324_v41 = vpop.f32.mrb[23].mxu1 }
 0x107   :  { %522 = vmatpush1.bf16.msra.mxu0 %v363_v1  ;;  %v370_v51 = vpack.c.bf16 %v324_v41, %v1508_v26 }
 0x108   :  { %640 = vmatprep.subr.bf16.mxu0 %v352_v30 }
 0x109   :  { %v215_v28 = vpop.f32.mrb[24].mxu0 }
 0x10a   :  { %1263 = vmatmul.mubr.msk.bf16.vlgmr.msra.gmra.mrb[36].mxu0 %vm96_vm0, %v1440_v31  ;;  %v217_v34 = vpop.f32.mrb[25].mxu0 }
 0x10b   :  { %641 = vmatpush1.bf16.msra.mxu0 %v348_v18  ;;  %v219_v46 = vpop.f32.mrb[26].mxu0  ;;  %672 = vmatprep.mubr.bf16.mxu0 %v1322_v2  ;;  %v328_v63 = vpop.f32.mrb[24].mxu1 }
 0x10c   :  { %v371_v30 = vpack.c.bf16 %v219_v46, %v215_v28  ;;  %v221_v53 = vpop.f32.mrb[27].mxu0  ;;  %722 = vmatprep.subr.bf16.mxu0 %v368_v21  ;;  %v1520_v1 = vpop.f32.mrb[25].mxu1 }
 0x10d   :  { %v372_v58 = vpack.c.bf16 %v221_v53, %v217_v34  ;;  %v332_v7 = vpop.f32.mrb[26].mxu1 }
 0x10e   :  { %v373_v17 = vpack.c.bf16 %v332_v7, %v328_v63  ;;  %v334_v18 = vpop.f32.mrb[27].mxu1 }
 0x10f   :  { %v374_v12 = vpack.c.bf16 %v334_v18, %v1520_v1 }
 0x111   :  { %v225_v3 = vpop.f32.mrb[28].mxu0 }
 0x112   :  { %v227_v14 = vpop.f32.mrb[29].mxu0  ;;  %1266 = vmatmul.mubr.msk.bf16.vlgmr.msra.gmra.mrb[40].mxu0 %vm96_vm0, %v1265_v60 }
 0x113   :  { %v229_v9 = vpop.f32.mrb[30].mxu0  ;;  %723 = vmatpush1.bf16.msra.mxu0 %v364_v4  ;;  %754 = vmatprep.mubr.bf16.mxu0 %v1322_v2  ;;  %v338_v23 = vpop.f32.mrb[28].mxu1 }
 0x114   :  { %v375_v15 = vpack.c.bf16 %v229_v9, %v225_v3  ;;  %842 = vmatprep.subr.bf16.mxu0 %v353_v37  ;;  %v231_v16 = vpop.f32.mrb[31].mxu0  ;;  %v340_v26 = vpop.f32.mrb[29].mxu1 }
 0x115   :  { %v376_v21 = vpack.c.bf16 %v231_v16, %v227_v14  ;;  %v342_v4 = vpop.f32.mrb[30].mxu1 }
 0x116   :  { %562 = vmatprep.subr.bf16.mxu1 %v375_v15  ;;  %v377_v28 = vpack.c.bf16 %v342_v4, %v338_v23  ;;  %v344_v29 = vpop.f32.mrb[31].mxu1 }
 0x117   :  { %563 = vmatpush1.bf16.msra.mxu1 %v371_v30  ;;  %v378_v32 = vpack.c.bf16 %v344_v29, %v340_v26 }
 0x118   :  { %681 = vmatprep.subr.bf16.mxu1 %v360_v55 }
 0x11a   :  { %1264 = vmatmul.mubr.msk.bf16.vlgmr.msra.gmra.mrb[36].mxu1 %vm96_vm0, %v1440_v31  ;;  %1268 = vmatmul.mubr.msk.bf16.vlgmr.msra.gmra.mrb[44].mxu0 %vm96_vm0, %v1265_v60  ;;  %v1270_v31 = vld [vmem:[%s1602_s0 + $0x8] sm:$0xf]  ;;  %s1323_s0 = smov [#allocation4]  }
 0x11b   :  { %682 = vmatpush1.bf16.msra.mxu1 %v356_v43  ;;  %843 = vmatpush1.bf16.msra.mxu0 %v349_v24  ;;  %s1222_s15 = sshll.u32 %s1323_s0, 4  ;;  %s1223_s15 = int_to_ptr.vmem [resolvable:$true] %s1222_s15 }
 0x11c   :  { %713 = vmatprep.mubr.bf16.mxu1 %v1322_v2  ;;  %874 = vmatprep.mubr.bf16.mxu0 %v1322_v2  ;;  %s1298_s16 = scalar_lea.vmem %s1223_s15, 4096  ;;  %p1303_p1 = scmp.lt.s32.totalorder %s1223_s15, %s1223_s15 }
 0x11d   :  { %924 = vmatprep.subr.bf16.mxu0 %v369_v39  ;;  %763 = vmatprep.subr.bf16.mxu1 %v376_v21  ;;  %p1299_p0 = scmp.ne.s32.totalorder %s1223_s15, %s1298_s16  ;;  %p1304_p2 = scmp.lt.s32.totalorder %s1298_s16, %s1298_s16 }
 0x11f   :  { %p1305_p3 = por %p1304_p2, %p1303_p1 }
 0x121   :  { %p1306_p4 = pnand %p1305_p3, %p1299_p0 }
 0x122   :  { %1267 = vmatmul.mubr.msk.bf16.vlgmr.msra.gmra.mrb[40].mxu1 %vm96_vm0, %v1265_v60  ;;  %1271 = vmatmul.mubr.msk.bf16.vlgmr.msra.gmra.mrb[48].mxu0 %vm96_vm0, %v1270_v31 }
 0x123   :  { %925 = vmatpush1.bf16.msra.mxu0 %v365_v10  ;;  %764 = vmatpush1.bf16.msra.mxu1 %v372_v58 }
 0x124   :  { %1044 = vmatprep.subr.bf16.mxu0 %v354_v40  ;;  %795 = vmatprep.mubr.bf16.mxu1 %v1322_v2 }
 0x125   :  { %956 = vmatprep.mubr.bf16.mxu0 %v1322_v2  ;;  %883 = vmatprep.subr.bf16.mxu1 %v361_v61 }
 0x12a   :  { %1269 = vmatmul.mubr.msk.bf16.vlgmr.msra.gmra.mrb[44].mxu1 %vm96_vm0, %v1265_v60  ;;  %1273 = vmatmul.mubr.msk.bf16.vlgmr.msra.gmra.mrb[52].mxu0 %vm96_vm0, %v1270_v31 }
 0x12b   :  { %1045 = vmatpush1.bf16.msra.mxu0 %v350_v27  ;;  %884 = vmatpush1.bf16.msra.mxu1 %v357_v49 }
 0x12c   :  { %915 = vmatprep.mubr.bf16.mxu1 %v1322_v2  ;;  %965 = vmatprep.subr.bf16.mxu1 %v377_v28 }
 0x12d   :  { %1076 = vmatprep.mubr.bf16.mxu0 %v1322_v2  ;;  %1126 = vmatprep.subr.bf16.mxu0 %v370_v51 }
 0x132   :  { %1272 = vmatmul.mubr.msk.bf16.vlgmr.msra.gmra.mrb[48].mxu1 %vm96_vm0, %v1270_v31  ;;  %1276 = vmatmul.mubr.msk.bf16.vlgmr.msra.gmra.mrb[56].mxu0 %vm96_vm0, %v1275_v19 }
 0x133   :  { %966 = vmatpush1.bf16.msra.mxu1 %v373_v17  ;;  %997 = vmatprep.mubr.bf16.mxu1 %v1322_v2 }
 0x134   :  { %1085 = vmatprep.subr.bf16.mxu1 %v362_v0  ;;  %1127 = vmatpush1.bf16.msra.mxu0 %v366_v13 }
 0x135   :  { %1158 = vmatprep.mubr.bf16.mxu0 %v1322_v2 }
 0x13a   :  { %1274 = vmatmul.mubr.msk.bf16.vlgmr.msra.gmra.mrb[52].mxu1 %vm96_vm0, %v1270_v31  ;;  %1278 = vmatmul.mubr.msk.bf16.vlgmr.msra.gmra.mrb[60].mxu0 %vm96_vm0, %v1275_v19 }
 0x13b   :  { %1086 = vmatpush1.bf16.msra.mxu1 %v358_v52  ;;  %1117 = vmatprep.mubr.bf16.mxu1 %v1322_v2 }
 0x13c   :  { %1167 = vmatprep.subr.bf16.mxu1 %v378_v32 }
 0x142   :  { %1277 = vmatmul.mubr.msk.bf16.vlgmr.msra.gmra.mrb[56].mxu1 %vm96_vm0, %v1275_v19 }
 0x143   :  { %1168 = vmatpush1.bf16.msra.mxu1 %v374_v12  ;;  %1199 = vmatprep.mubr.bf16.mxu1 %v1322_v2 }
 0x14a   :  { %1279 = vmatmul.mubr.msk.bf16.vlgmr.msra.gmra.mrb[60].mxu1 %vm96_vm0, %v1275_v19 }
 0x1bd   :  { %v473_v20 = vpop.f32.mrb[32].mxu0 }
 0x1be   :  { %603 = vst [vmem:[#allocation4] sm:$0xff] %v473_v20  ;;  %v475_v22 = vpop.f32.mrb[33].mxu0 }
 0x1bf   :  { %604 = vst [vmem:[#allocation4 + $0x8] sm:$0xff] %v475_v22  ;;  %v477_v24 = vpop.f32.mrb[34].mxu0 }
 0x1c0   :  { %v478_v25 = vpop.f32.mrb[35].mxu0 }
 0x1cd   :  { %v514_v27 = vpop.f32.mrb[32].mxu1 }
 0x1ce   :  { %605 = vst [vmem:[#allocation4 + $0x10] sm:$0xff] %v514_v27  ;;  %v516_v33 = vpop.f32.mrb[33].mxu1 }
 0x1cf   :  { %606 = vst [vmem:[#allocation4 + $0x18] sm:$0xff] %v516_v33  ;;  %v518_v35 = vpop.f32.mrb[34].mxu1 }
 0x1d0   :  { %v519_v36 = vpop.f32.mrb[35].mxu1 }
 0x1dd   :  { %v555_v37 = vpop.f32.mrb[36].mxu0 }
 0x1de   :  { %607 = vst [vmem:[#allocation4 + $0x20] sm:$0xff] %v555_v37  ;;  %v557_v38 = vpop.f32.mrb[37].mxu0 }
 0x1df   :  { %608 = vst [vmem:[#allocation4 + $0x28] sm:$0xff] %v557_v38  ;;  %v559_v40 = vpop.f32.mrb[38].mxu0 }
 0x1e0   :  { %v560_v2 = vpop.f32.mrb[39].mxu0 }
 0x1e5   :  { %v674_v42 = vpop.f32.mrb[40].mxu0 }
 0x1e6   :  { %805 = vst [vmem:[#allocation4 + $0x40] sm:$0xff] %v674_v42  ;;  %v676_v43 = vpop.f32.mrb[41].mxu0 }
 0x1e7   :  { %806 = vst [vmem:[#allocation4 + $0x48] sm:$0xff] %v676_v43  ;;  %v678_v44 = vpop.f32.mrb[42].mxu0 }
 0x1e8   :  { %v679_v45 = vpop.f32.mrb[43].mxu0 }
 0x1ed   :  { %v596_v47 = vpop.f32.mrb[36].mxu1  ;;  %v756_v48 = vpop.f32.mrb[44].mxu0 }
 0x1ee   :  { %609 = vst [vmem:[#allocation4 + $0x30] sm:$0xff] %v596_v47  ;;  %v598_v49 = vpop.f32.mrb[37].mxu1  ;;  %809 = vst [vmem:[#allocation4 + $0x60] sm:$0xff] %v756_v48  ;;  %v758_v50 = vpop.f32.mrb[45].mxu0 }
 0x1ef   :  { %610 = vst [vmem:[#allocation4 + $0x38] sm:$0xff] %v598_v49  ;;  %v600_v52 = vpop.f32.mrb[38].mxu1  ;;  %810 = vst [vmem:[#allocation4 + $0x68] sm:$0xff] %v758_v50  ;;  %v760_v54 = vpop.f32.mrb[46].mxu0 }
 0x1f0   :  { %v601_v55 = vpop.f32.mrb[39].mxu1  ;;  %v761_v56 = vpop.f32.mrb[47].mxu0 }
 0x1f5   :  { %v715_v57 = vpop.f32.mrb[40].mxu1  ;;  %v876_v59 = vpop.f32.mrb[48].mxu0 }
 0x1f6   :  { %807 = vst [vmem:[#allocation4 + $0x50] sm:$0xff] %v715_v57  ;;  %v717_v61 = vpop.f32.mrb[41].mxu1  ;;  %1007 = vst [vmem:[#allocation4 + $0x80] sm:$0xff] %v876_v59  ;;  %v878_v62 = vpop.f32.mrb[49].mxu0 }
 0x1f7   :  { %808 = vst [vmem:[#allocation4 + $0x58] sm:$0xff] %v717_v61  ;;  %v719_v0 = vpop.f32.mrb[42].mxu1  ;;  %1008 = vst [vmem:[#allocation4 + $0x88] sm:$0xff] %v878_v62  ;;  %v880_v5 = vpop.f32.mrb[50].mxu0 }
 0x1f8   :  { %v720_v6 = vpop.f32.mrb[43].mxu1  ;;  %v881_v8 = vpop.f32.mrb[51].mxu0 }
 0x1fd   :  { %v797_v10 = vpop.f32.mrb[44].mxu1  ;;  %v958_v11 = vpop.f32.mrb[52].mxu0 }
 0x1fe   :  { %811 = vst [vmem:[#allocation4 + $0x70] sm:$0xff] %v797_v10  ;;  %v799_v13 = vpop.f32.mrb[45].mxu1  ;;  %1011 = vst [vmem:[#allocation4 + $0xa0] sm:$0xff] %v958_v11  ;;  %v960_v34 = vpop.f32.mrb[53].mxu0 }
 0x1ff   :  { %812 = vst [vmem:[#allocation4 + $0x78] sm:$0xff] %v799_v13  ;;  %v801_v39 = vpop.f32.mrb[46].mxu1  ;;  %1012 = vst [vmem:[#allocation4 + $0xa8] sm:$0xff] %v960_v34  ;;  %v962_v41 = vpop.f32.mrb[54].mxu0 }
 0x200   :  { %v802_v46 = vpop.f32.mrb[47].mxu1  ;;  %v963_v51 = vpop.f32.mrb[55].mxu0 }
 0x205   :  { %v917_v30 = vpop.f32.mrb[48].mxu1  ;;  %v1078_v53 = vpop.f32.mrb[56].mxu0 }
 0x206   :  { %1009 = vst [vmem:[#allocation4 + $0x90] sm:$0xff] %v917_v30  ;;  %v919_v58 = vpop.f32.mrb[49].mxu1  ;;  %1209 = vst [vmem:[#allocation4 + $0xc0] sm:$0xff] %v1078_v53  ;;  %v1080_v60 = vpop.f32.mrb[57].mxu0 }
 0x207   :  { %1010 = vst [vmem:[#allocation4 + $0x98] sm:$0xff] %v919_v58  ;;  %v921_v63 = vpop.f32.mrb[50].mxu1  ;;  %1210 = vst [vmem:[#allocation4 + $0xc8] sm:$0xff] %v1080_v60  ;;  %v1082_v1 = vpop.f32.mrb[58].mxu0 }
 0x208   :  { %v922_v3 = vpop.f32.mrb[51].mxu1  ;;  %v1083_v7 = vpop.f32.mrb[59].mxu0 }
 0x20d   :  { %v999_v14 = vpop.f32.mrb[52].mxu1  ;;  %v1160_v17 = vpop.f32.mrb[60].mxu0 }
 0x20e   :  { %1013 = vst [vmem:[#allocation4 + $0xb0] sm:$0xff] %v999_v14  ;;  %v1001_v18 = vpop.f32.mrb[53].mxu1  ;;  %1213 = vst [vmem:[#allocation4 + $0xe0] sm:$0xff] %v1160_v17  ;;  %v1162_v9 = vpop.f32.mrb[61].mxu0 }
 0x20f   :  { %1014 = vst [vmem:[#allocation4 + $0xb8] sm:$0xff] %v1001_v18  ;;  %v1003_v12 = vpop.f32.mrb[54].mxu1  ;;  %1214 = vst [vmem:[#allocation4 + $0xe8] sm:$0xff] %v1162_v9  ;;  %v1164_v15 = vpop.f32.mrb[62].mxu0 }
 0x210   :  { %v1004_v16 = vpop.f32.mrb[55].mxu1  ;;  %v1165_v21 = vpop.f32.mrb[63].mxu0 }
 0x215   :  { %v1119_v23 = vpop.f32.mrb[56].mxu1 }
 0x216   :  { %1211 = vst [vmem:[#allocation4 + $0xd0] sm:$0xff] %v1119_v23  ;;  %v1121_v26 = vpop.f32.mrb[57].mxu1 }
 0x217   :  { %1212 = vst [vmem:[#allocation4 + $0xd8] sm:$0xff] %v1121_v26  ;;  %v1123_v4 = vpop.f32.mrb[58].mxu1 }
 0x218   :  { %v1124_v28 = vpop.f32.mrb[59].mxu1 }
 0x21d   :  { %v1201_v29 = vpop.f32.mrb[60].mxu1 }
 0x21e   :  { %1215 = vst [vmem:[#allocation4 + $0xf0] sm:$0xff] %v1201_v29  ;;  %v1203_v32 = vpop.f32.mrb[61].mxu1 }
 0x21f   :  { %1216 = vst [vmem:[#allocation4 + $0xf8] sm:$0xff] %v1203_v32  ;;  %v1205_v31 = vpop.f32.mrb[62].mxu1 }
 0x220   :  { %v1206_v19 = vpop.f32.mrb[63].mxu1 }
 0x221   :  { %1309 = shalt.err (!%p1306_p4)
}
 0x222   :  { %s1310_s19 = scalar_lea.hbm %s1605_s3, 4096 }
 0x223   :  { %p1311_p5 = scmp.ne.s32.totalorder %s1605_s3, %s1310_s19  ;;  %p1314_p6 = scmp.lt.u32.totalorder %s1310_s19, %s1605_s3 }
 0x225   :  { %p1316_p7 = pnand %p1314_p6, %p1311_p5 }
 0x227   :  { %1319 = shalt.err (!%p1316_p7)
}
 0x228   :  { %s1324_s24 = smov 1024   ;;  %s1325_s25 = smov 64  }
 0x229   :  { %1228 = dma.vmem_to_hbm [thread:$0]  %s1223_s15, 4096, %s1605_s3, [#allocation5], %s1324_s24, %s1324_s24, %s1325_s25  }
 0x22a   :  { %1320 = dma.done.wait [#allocation5], 4096  }
 0x22b   :  { %1321 = vsyncadd [#allocation5], 4294963200 }
 0x22c   :  { %1232 = vsyncpa [#allocation5], 1 }

</bundles_post_ra>
